<compile_context>
chip_gen: v7x
topology: tpu7x:2x2x1
jax: 0.10.0
libtpu: 0.0.40
codegen_flags: <defaults>
</compile_context>

<pallas_src>
import math

import jax
import jax.numpy as jnp
from jax import lax
from jax.experimental import pallas as pl
from jax.experimental.pallas import tpu as pltpu


def _make_mse_kernel(rows_valid, tile_rows, lane, need_mask):
    """Per-tile partial-sum kernel (closure over static tiling params)."""

    def kernel(y_ref, yp_ref, out_ref):
        d = y_ref[...].astype(jnp.float32) - yp_ref[...].astype(jnp.float32)
        sq = d * d
        if need_mask:
            # Mask garbage rows of the ragged last tile (values there are
            # unspecified); jnp.where kills NaN/inf contributions.
            base = pl.program_id(0) * tile_rows
            row_ids = base + lax.broadcasted_iota(
                jnp.int32, (tile_rows, lane), 0
            )
            sq = jnp.where(row_ids < rows_valid, sq, 0.0)
        # Sublane-axis reduction only: mostly VPU vreg adds, hidden under DMA.
        out_ref[...] = jnp.sum(sq, axis=0, keepdims=True)

    return kernel


def mse_pallas(y, y_pred, *, target_block_bytes=4 * 1024 * 1024):
    assert y.shape == y_pred.shape, "MSELoss requires matching shapes here"
    n_total = math.prod(y.shape) if y.shape else 1

    # Flatten; contiguous reshapes are metadata-only (no HBM copies).
    yf = y.reshape(-1)
    ypf = y_pred.reshape(-1)

    # Rare fallback: if the element count is not a multiple of 128, pad the
    # flat vectors with zeros (identical in both -> contributes 0 to the sum).
    n = yf.shape[0]
    pad = (-n) % 128
    if pad:
        yf = jnp.pad(yf, (0, pad))
        ypf = jnp.pad(ypf, (0, pad))
    n_pad = n + pad

    # Lane width: largest of {1024, 512, 256, 128} dividing the flat length,
    # so every vld is fully lane-dense regardless of the original last dim.
    lane = 128
    for c in (1024, 512, 256):
        if n_pad % c == 0:
            lane = c
            break
    rows = n_pad // lane
    y2 = yf.reshape(rows, lane)
    yp2 = ypf.reshape(rows, lane)

    # Row-tile size targeting ~target_block_bytes (f32) per input block,
    # rounded to a multiple of 8 sublanes.  Double-buffered 2-input footprint
    # stays well under the 48 MiB VMEM limit set below (safe on v7x's 64 MiB).
    max_rows = max(8, (target_block_bytes // (4 * lane)) // 8 * 8)
    if rows <= max_rows:
        tile_rows = rows          # full-extent block: always a legal shape
        grid_rows = 1
        need_mask = False
    else:
        tile_rows = max_rows
        grid_rows = pl.cdiv(rows, tile_rows)
        need_mask = (rows % tile_rows) != 0

    kernel = _make_mse_kernel(rows, tile_rows, lane, need_mask)

    itemsize = jnp.dtype(y.dtype).itemsize
    cost = pl.CostEstimate(
        flops=3 * n_total,
        transcendentals=0,
        bytes_accessed=2 * n_total * itemsize + 4 * grid_rows * lane,
    )

    partials = pl.pallas_call(
        kernel,
        out_shape=jax.ShapeDtypeStruct((grid_rows, lane), jnp.float32),
        grid_spec=pltpu.PrefetchScalarGridSpec(
            num_scalar_prefetch=0,
            grid=(grid_rows,),
            in_specs=[
                pl.BlockSpec((tile_rows, lane), lambda i: (i, 0)),
                pl.BlockSpec((tile_rows, lane), lambda i: (i, 0)),
            ],
            out_specs=pl.BlockSpec((1, lane), lambda i: (i, 0)),
        ),
        compiler_params=pltpu.CompilerParams(
            # Independent per-tile partial sums -> row-tile axis is parallel
            # (lets megacore split it on v7x; harmless on single-TC chips).
            dimension_semantics=("parallel",),
            vmem_limit_bytes=48 * 1024 * 1024,
        ),
        cost_estimate=cost,
    )(y2, yp2)

    # Final cross-tile / cross-lane reduce + mean on the tiny partials array.
    return jnp.sum(partials) / jnp.float32(n_total)


if __name__ == "__main__":
    key = jax.random.PRNGKey(0)
    k1, k2 = jax.random.split(key)
    # Small shapes consistent with the module (arbitrary-shape scalar loss):
    # seq=8, hidden=32.
    y = jax.random.normal(k1, (8, 32), dtype=jnp.float32)
    y_pred = jax.random.normal(k2, (8, 32), dtype=jnp.float32)

    loss = mse_pallas(y, y_pred)
    jax.block_until_ready(loss)

    # Sanity check against the pure-JAX reference.
    ref = jnp.mean((y - y_pred) ** 2)
    assert jnp.allclose(loss, ref, rtol=1e-6, atol=1e-6), (loss, ref)

    print("KERNEL_OK")
</pallas_src>

<mosaic_0001>
module attributes {stable_mosaic.version = 11 : i64} {
  func.func @kernel(%arg0: i32, %arg1: memref<1x256xf32, #tpu.memory_space<vmem>>, %arg2: memref<1x256xf32, #tpu.memory_space<vmem>>, %arg3: memref<1x256xf32, #tpu.memory_space<vmem>>) attributes {dimension_semantics = [#tpu.dimension_semantics<parallel>], iteration_bounds = array<i64: 1>, scalar_prefetch = 0 : i64, scratch_operands = 0 : i64, tpu.core_type = #tpu.core_type<tc>, window_params = [{transform_indices = @transform_0, window_bounds = array<i64: 1, 256>}, {transform_indices = @transform_1, window_bounds = array<i64: 1, 256>}, {transform_indices = @transform_2, window_bounds = array<i64: 1, 256>}]} {
    %c0 = arith.constant 0 : index
    %c0_0 = arith.constant 0 : index
    %0 = vector.load %arg1[%c0, %c0_0] : memref<1x256xf32, #tpu.memory_space<vmem>>, vector<1x256xf32>
    %c0_1 = arith.constant 0 : index
    %c0_2 = arith.constant 0 : index
    %1 = vector.load %arg2[%c0_1, %c0_2] : memref<1x256xf32, #tpu.memory_space<vmem>>, vector<1x256xf32>
    %2 = arith.subf %0, %1 : vector<1x256xf32>
    %3 = arith.mulf %2, %2 : vector<1x256xf32>
    %cst = arith.constant dense<0.000000e+00> : vector<256xf32>
    %4 = vector.multi_reduction <add>, %3, %cst [0] : vector<1x256xf32> to vector<256xf32>
    %5 = vector.shape_cast %4 : vector<256xf32> to vector<1x256xf32>
    %c0_3 = arith.constant 0 : index
    %c0_4 = arith.constant 0 : index
    %6 = vector.load %arg3[%c0_3, %c0_4] : memref<1x256xf32, #tpu.memory_space<vmem>>, vector<1x256xf32>
    tpu.vector_store %arg3[%c0_3, %c0_4], %5 {strides = array<i32>} : memref<1x256xf32, #tpu.memory_space<vmem>>, vector<1x256xf32>,
    return
  }
  func.func @transform_0(%arg0: i32) -> (i32, i32) {
    %c0_i32 = arith.constant 0 : i32
    %c0_i32_0 = arith.constant 0 : i32
    return %arg0, %c0_i32 : i32, i32
  }
  func.func @transform_1(%arg0: i32) -> (i32, i32) {
    %c0_i32 = arith.constant 0 : i32
    %c0_i32_0 = arith.constant 0 : i32
    return %arg0, %c0_i32 : i32, i32
  }
  func.func @transform_2(%arg0: i32) -> (i32, i32) {
    %c0_i32 = arith.constant 0 : i32
    %c0_i32_0 = arith.constant 0 : i32
    return %arg0, %c0_i32 : i32, i32
  }
}

</mosaic_0001>

<bundles_post_ra>
// kernel: tpu_custom_call.1
= control target key start
LH: loop header
LB: loop body
LE: loop exit
PB: predicated region body
PF: predicated region fallthrough
CT: control target
= control target key end

     0   :  { %7 = vsyncpa [#allocation3], 0  ;;  %s143_s0 = inlined_call_operand.hbm [shape: f32[1,256], index: 0, kind: input, shape index: {}]   ;;  %s144_s1 = inlined_call_operand.vmem [shape: f32[1,256], index: 1, kind: input, shape index: {}]   ;;  %s145_s2 = inlined_call_operand.hbm [shape: f32[1,256], index: 2, kind: output, shape index: {}]  }
   0x1   :  { %8 = vsyncpa [#allocation4], 0  ;;  %s99_s9 = smov [#allocation2]   ;;  %s51_s13 = scalar_lea.hbm %s143_s0, 32 }
   0x2   :  { %s15_s10 = sshll.u32 %s99_s9, 4  ;;  %p52_p0 = scmp.ne.s32.totalorder %s143_s0, %s51_s13  ;;  %s16_s10 = int_to_ptr.vmem [resolvable:$true] %s15_s10 }
   0x3   :  { %p55_p1 = scmp.lt.u32.totalorder %s51_s13, %s143_s0 }
   0x5   :  { %p57_p2 = pnand %p55_p1, %p52_p0 }
   0x7   :  { %60 = shalt.err (!%p57_p2)
}
   0x8   :  { %s61_s18 = scalar_lea.vmem %s16_s10, 32  ;;  %p66_p4 = scmp.lt.s32.totalorder %s16_s10, %s16_s10 }
   0x9   :  { %p62_p3 = scmp.ne.s32.totalorder %s16_s10, %s61_s18  ;;  %p67_p5 = scmp.lt.s32.totalorder %s61_s18, %s61_s18 }
   0xb   :  { %p68_p6 = por %p67_p5, %p66_p4 }
   0xd   :  { %p69_p7 = pnand %p68_p6, %p62_p3 }
   0xf   :  { %72 = shalt.err (!%p69_p7)
}
  0x10   :  { %18 = dma.hbm_to_vmem [thread:$0]  %s143_s0, 32, %s16_s10, [#allocation3]  }
  0x11   :  { %95 = dma.done.wait [#allocation3], 32  }
  0x12   :  { %96 = vsyncadd [#allocation3], 4294967264  ;;  %v29_v0 = vlaneseq  ;;  %v24_v1 = vld [vmem:[#allocation2] sm:$0x3]  ;;  %s100_s23 = smov [#allocation5]  }
  0x13   :  { %v25_v2 = vld [vmem:[%s144_s1] sm:$0x3]  ;;  %s40_s24 = sshll.u32 %s100_s23, 4  ;;  %s41_s24 = int_to_ptr.vmem [resolvable:$true] %s40_s24 }
  0x14   :  { %v26_v3 = vsub.f32 %v24_v1, %v25_v2  ;;  %vm31_vm0 = vcmp.lt.s32.totalorder %v29_v0, 256  ;;  %s73_s25 = scalar_lea.vmem %s41_s24, 32  ;;  %p78_p9 = scmp.lt.s32.totalorder %s41_s24, %s41_s24 }
  0x15   :  { %p74_p8 = scmp.ne.s32.totalorder %s41_s24, %s73_s25  ;;  %p79_p10 = scmp.lt.s32.totalorder %s73_s25, %s73_s25 }
  0x16   :  { %v27_v4 = vmul.f32 %v26_v3, %v26_v3 }
  0x17   :  { %p80_p11 = por %p79_p10, %p78_p9 }
  0x18   :  { %33 = vst.msk [vmem:[#allocation5] sm:$0x3] %vm31_vm0, %v27_v4 }
  0x19   :  { %p81_p12 = pnand %p80_p11, %p74_p8 }
  0x1b   :  { %84 = shalt.err (!%p81_p12)
}
  0x1c   :  { %s85_s27 = scalar_lea.hbm %s145_s2, 32 }
  0x1d   :  { %p86_p13 = scmp.ne.s32.totalorder %s145_s2, %s85_s27  ;;  %p89_p0 = scmp.lt.u32.totalorder %s85_s27, %s145_s2 }
  0x1f   :  { %p91_p1 = pnand %p89_p0, %p86_p13 }
  0x21   :  { %94 = shalt.err (!%p91_p1)
}
  0x22   :  { %43 = dma.vmem_to_hbm [thread:$0]  %s41_s24, 32, %s145_s2, [#allocation4]  }
  0x23   :  { %97 = dma.done.wait [#allocation4], 32  }
  0x24   :  { %98 = vsyncadd [#allocation4], 4294967264 }
  0x25   :  { %47 = vsyncpa [#allocation3], 1 }
  0x26   :  { %48 = vsyncpa [#allocation4], 1 }

</bundles_post_ra>
